<compile_context>
chip_gen: v6e
topology: v6e:2x2x1
jax: 0.10.0
libtpu: 0.0.40
codegen_flags: <defaults>
</compile_context>

<pallas_src>
import functools

import jax
import jax.numpy as jnp
from jax.experimental import pallas as pl
from jax.experimental.pallas import tpu as pltpu


def _gate_kernel(kv_ref, wt_ref, m_ref, acc_ref, *, inv_t):
    """Gate: m[n, b, :] = (mean_T kv[:, b, n, :]) @ W.T

    Grid: (T,) -- streams kv one time step per grid iteration (reduction axis).
      kv_ref : (1, B, Nkv, D)    one time step of kv
      wt_ref : (D, D)            W transposed (x @ W.T == x @ wt), resident
      m_ref  : (Nkv, B, D)       output gate, written at the last grid step
      acc_ref: (B, Nkv, D) f32   running sum over T (persistent scratch)
    """
    t = pl.program_id(0)

    @pl.when(t == 0)
    def _init():
        acc_ref[...] = jnp.zeros_like(acc_ref)

    acc_ref[...] += kv_ref[0].astype(jnp.float32)

    @pl.when(t == pl.num_programs(0) - 1)
    def _finalize():
        wt = wt_ref[...].astype(jnp.float32)
        nkv = m_ref.shape[0]
        # Nkv is small (== T for the reference broadcast), so a static loop of
        # tiny (B, D) x (D, D) matmuls avoids any in-kernel reshape/transpose
        # relayouts while writing m directly in time-major (Nkv, B, D) order.
        for n in range(nkv):
            m_ref[n] = jnp.dot(acc_ref[:, n, :] * inv_t, wt,
                               preferred_element_type=jnp.float32)


def _gated_lif_kernel(m_ref, q_ref, out_ref, *, tau, v_th):
    """Fused gate-multiply + MultiStepLIF forward over one lane chunk.

    Grid: (Nq*D // LBLK,) -- independent lane chunks ("parallel").
      m_ref  : (Nkv, B, D)       gate rows per output time step (resident)
      q_ref  : (T,   B, LBLK)    folded queries; LBLK is a multiple of D
      out_ref: (Tout, B, LBLK)   output spikes (lane-dense stores)
    """
    nkv, b, d = m_ref.shape
    tq = q_ref.shape[0]
    tout, _, lblk = out_ref.shape
    nrep = lblk // d
    inv_tau = 1.0 / tau

    def step(t, v):
        # torch broadcasting: m is indexed by the output time step unless Nkv==1.
        g = m_ref[t if nkv == tout else 0]                   # (B, D)
        if nrep > 1:                                         # tile gate across the
            g = jnp.concatenate([g] * nrep, axis=-1)         # folded Nq tokens
        x = g * q_ref[t if tq == tout else 0].astype(jnp.float32)
        # LIF charge (decay_input=True, v_reset=0): v <- v + (x - v) / tau
        v = v + (x - v) * inv_tau
        fired = v >= v_th                                    # Heaviside spike
        out_ref[t] = fired.astype(out_ref.dtype)
        return jnp.where(fired, 0.0, v)                      # hard reset to 0

    v0 = jnp.zeros((b, lblk), jnp.float32)
    jax.lax.fori_loop(0, tout, step, v0, unroll=True)


def _pick_lane_block(nqd, d, t_steps, b,
                     block_budget_bytes=8 << 20, carry_budget_bytes=128 << 10):
    """Lane-chunk width for the folded Nq*D axis.

    Must divide Nq*D, keep whole tokens (multiple of D) and be a multiple of 128
    (unmasked stores) unless it is the full axis.  Picks the largest width whose
    double-buffered q/out blocks stay under ~8 MiB and whose LIF carry stays
    <= 128 KiB (well inside the vreg budget); conservative for v7x's 64 MiB VMEM.
    """
    cands = [k for k in range(d, nqd + 1, d)
             if nqd % k == 0 and (k % 128 == 0 or k == nqd)]
    fits = [k for k in cands
            if 16 * t_steps * b * k <= block_budget_bytes
            and 4 * b * k <= carry_budget_bytes]
    return max(fits) if fits else min(cands)


def memory_update(q, kv, w, *, tau=2.0, v_threshold=0.5, lane_block=None):
    """q: (T,B,Nq,D), kv: (T,B,Nkv,D), w: (D,D) nn.Linear weight (out, in)."""
    T, B, Nq, D = q.shape
    Tk, Bk, Nkv, Dk = kv.shape
    assert (T, B, D) == (Tk, Bk, Dk), "q/kv shape mismatch"
    # torch broadcasting of (Nkv,B,1,D) against (T,B,Nq,D) on the leading axis
    assert Nkv == T or Nkv == 1 or T == 1, "Nkv and T must be broadcastable"
    assert w.shape == (D, D)
    Tout = max(Nkv, T)

    wt = jnp.transpose(w)                      # tiny (D,D); x @ W.T == x @ wt

    # ---- kernel A: gate = mean_T(kv) @ W.T, streamed over T ------------------
    gate = pl.pallas_call(
        functools.partial(_gate_kernel, inv_t=1.0 / T),
        grid=(T,),
        in_specs=[
            pl.BlockSpec((1, B, Nkv, D), lambda t: (t, 0, 0, 0)),   # kv, one step
            pl.BlockSpec((D, D), lambda t: (0, 0)),                 # W.T, resident
        ],
        out_specs=pl.BlockSpec((Nkv, B, D), lambda t: (0, 0, 0)),   # accumulator
        out_shape=jax.ShapeDtypeStruct((Nkv, B, D), jnp.float32),
        scratch_shapes=[pltpu.VMEM((B, Nkv, D), jnp.float32)],
        compiler_params=pltpu.CompilerParams(
            dimension_semantics=("arbitrary",),        # sequential T reduction
            vmem_limit_bytes=32 * 1024 * 1024,
        ),
    )(kv, wt)

    # ---- kernel B: fused gate-multiply + LIF, lane-dense, gridded over Nq*D --
    NqD = Nq * D
    q2 = q.reshape(T, B, NqD)                  # free reshape (contiguous dims)
    if lane_block is None:
        lblk = _pick_lane_block(NqD, D, Tout, B)
    else:
        lblk = int(lane_block)
        assert NqD % lblk == 0 and lblk % D == 0 and (lblk % 128 == 0 or lblk == NqD)

    out2 = pl.pallas_call(
        functools.partial(_gated_lif_kernel, tau=float(tau), v_th=float(v_threshold)),
        grid=(NqD // lblk,),
        in_specs=[
            pl.BlockSpec((Nkv, B, D), lambda j: (0, 0, 0)),     # gate, resident
            pl.BlockSpec((T, B, lblk), lambda j: (0, 0, j)),    # q lane chunk
        ],
        out_specs=pl.BlockSpec((Tout, B, lblk), lambda j: (0, 0, j)),
        out_shape=jax.ShapeDtypeStruct((Tout, B, NqD), jnp.float32),
        compiler_params=pltpu.CompilerParams(
            dimension_semantics=("parallel",),         # megacore-shardable on v7x
            vmem_limit_bytes=32 * 1024 * 1024,
        ),
    )(gate, q2)

    return out2.reshape(Tout, B, Nq, D)        # free reshape back


def memory_update_reference(q, kv, w, *, tau=2.0, v_threshold=0.5):
    """Pure-JAX reference mirroring the PyTorch forward."""
    k = jnp.einsum("tbnd,ed->tbne", kv, w)                               # Linear, no bias
    m = jnp.mean(jnp.transpose(k, (2, 1, 0, 3)), axis=2, keepdims=True)  # (Nkv,B,1,D)
    upd = m * q                                                          # (Tout,B,Nq,D)

    def step(v, x):
        v = v + (x - v) / tau
        s = (v >= v_threshold).astype(jnp.float32)
        return jnp.where(s > 0, 0.0, v), s

    _, spikes = jax.lax.scan(step, jnp.zeros(upd.shape[1:], jnp.float32), upd)
    return spikes


if __name__ == "__main__":
    # Small shapes consistent with the module: T time steps, batch B, tokens N, dim D.
    # (Nkv == T so the torch broadcast k.mean(...) * q is well defined.)
    T, B, Nq, Nkv, D = 8, 2, 8, 8, 32

    key = jax.random.PRNGKey(0)
    kq, kkv, kw = jax.random.split(key, 3)
    q = jax.random.normal(kq, (T, B, Nq, D), dtype=jnp.float32)
    kv = jax.random.normal(kkv, (T, B, Nkv, D), dtype=jnp.float32)
    # Deterministic gate weight, nn.Linear-style shape (out_features, in_features).
    w = jax.random.normal(kw, (D, D), dtype=jnp.float32) * (D ** -0.5)

    out = jax.block_until_ready(memory_update(q, kv, w, tau=2.0, v_threshold=0.5))
    ref = memory_update_reference(q, kv, w, tau=2.0, v_threshold=0.5)

    assert out.shape == (T, B, Nq, D) and out.dtype == jnp.float32
    # spikes are 0/1; tolerate (vanishingly rare) threshold flips from MXU rounding
    assert float(jnp.mean(jnp.abs(out - ref))) < 1e-2, "mismatch vs reference"

    # Also exercise the multi-chunk grid path (two lane chunks of 128).
    out_chunked = jax.block_until_ready(
        memory_update(q, kv, w, tau=2.0, v_threshold=0.5, lane_block=128))
    assert float(jnp.mean(jnp.abs(out_chunked - ref))) < 1e-2, "chunked mismatch"

    print("KERNEL_OK")
</pallas_src>

<mosaic_0001>
module attributes {stable_mosaic.version = 11 : i64} {
  func.func @_gate_kernel(%arg0: i32, %arg1: memref<1x2x8x32xf32, #tpu.memory_space<vmem>>, %arg2: memref<32x32xf32, #tpu.memory_space<vmem>>, %arg3: memref<8x2x32xf32, #tpu.memory_space<vmem>>, %arg4: memref<2x8x32xf32, #tpu.memory_space<vmem>>) attributes {dimension_semantics = [#tpu.dimension_semantics<arbitrary>], iteration_bounds = array<i64: 8>, scalar_prefetch = 0 : i64, scratch_operands = 1 : i64, tpu.core_type = #tpu.core_type<tc>, window_params = [{transform_indices = @transform_0, window_bounds = array<i64: 1, 2, 8, 32>}, {pipeline_mode = #tpu.pipeline_mode<synchronous>, transform_indices = @transform_1, window_bounds = array<i64: 32, 32>}, {pipeline_mode = #tpu.pipeline_mode<synchronous>, transform_indices = @transform_2, window_bounds = array<i64: 8, 2, 32>}]} {
    %c0_i32 = arith.constant 0 : i32
    %0 = arith.cmpi eq, %arg0, %c0_i32 : i32
    %1 = arith.extui %0 : i1 to i32
    %c0_i32_0 = arith.constant 0 : i32
    %2 = arith.cmpi ne, %1, %c0_i32_0 : i32
    scf.if %2 {
      %cst = arith.constant 0.000000e+00 : f32
      %11 = vector.broadcast %cst : f32 to vector<2x8x32xf32>
      %c0_11 = arith.constant 0 : index
      %c0_12 = arith.constant 0 : index
      %c0_13 = arith.constant 0 : index
      %12 = vector.load %arg4[%c0_11, %c0_12, %c0_13] : memref<2x8x32xf32, #tpu.memory_space<vmem>>, vector<2x8x32xf32>
      tpu.vector_store %arg4[%c0_11, %c0_12, %c0_13], %11 {strides = array<i32>} : memref<2x8x32xf32, #tpu.memory_space<vmem>>, vector<2x8x32xf32>,
    } else {
    }
    %c0 = arith.constant 0 : index
    %c0_1 = arith.constant 0 : index
    %c0_2 = arith.constant 0 : index
    %3 = vector.load %arg4[%c0, %c0_1, %c0_2] : memref<2x8x32xf32, #tpu.memory_space<vmem>>, vector<2x8x32xf32>
    %c0_3 = arith.constant 0 : index
    %c0_4 = arith.constant 0 : index
    %c0_5 = arith.constant 0 : index
    %c0_6 = arith.constant 0 : index
    %4 = vector.load %arg1[%c0_3, %c0_4, %c0_5, %c0_6] : memref<1x2x8x32xf32, #tpu.memory_space<vmem>>, vector<1x2x8x32xf32>
    %5 = vector.shape_cast %4 : vector<1x2x8x32xf32> to vector<2x8x32xf32>
    %6 = arith.addf %3, %5 : vector<2x8x32xf32>
    %c0_7 = arith.constant 0 : index
    %c0_8 = arith.constant 0 : index
    %c0_9 = arith.constant 0 : index
    %7 = vector.load %arg4[%c0_7, %c0_8, %c0_9] : memref<2x8x32xf32, #tpu.memory_space<vmem>>, vector<2x8x32xf32>
    tpu.vector_store %arg4[%c0_7, %c0_8, %c0_9], %6 {strides = array<i32>} : memref<2x8x32xf32, #tpu.memory_space<vmem>>, vector<2x8x32xf32>,
    %c7_i32 = arith.constant 7 : i32
    %8 = arith.cmpi eq, %arg0, %c7_i32 : i32
    %9 = arith.extui %8 : i1 to i32
    %c0_i32_10 = arith.constant 0 : i32
    %10 = arith.cmpi ne, %9, %c0_i32_10 : i32
    scf.if %10 {
      %c0_11 = arith.constant 0 : index
      %c0_12 = arith.constant 0 : index
      %11 = vector.load %arg2[%c0_11, %c0_12] : memref<32x32xf32, #tpu.memory_space<vmem>>, vector<32x32xf32>
      %c0_13 = arith.constant 0 : index
      %c0_14 = arith.constant 0 : index
      %c0_15 = arith.constant 0 : index
      %12 = vector.load %arg4[%c0_13, %c0_14, %c0_15] : memref<2x8x32xf32, #tpu.memory_space<vmem>>, vector<2x1x32xf32>
      %13 = vector.shape_cast %12 : vector<2x1x32xf32> to vector<2x32xf32>
      %cst = arith.constant 1.250000e-01 : f32
      %14 = vector.broadcast %cst : f32 to vector<2x32xf32>
      %15 = arith.mulf %13, %14 : vector<2x32xf32>
      %cst_16 = arith.constant dense<0.000000e+00> : vector<2x32xf32>
      %16 = tpu.matmul %15, %11, %cst_16 {dimension_numbers = #tpu.dot_dimension_numbers<[1], [0], [0], [1], [0, 0, 1, 1], [], []>} : vector<2x32xf32>, vector<32x32xf32>, vector<2x32xf32> -> vector<2x32xf32>
      %c0_17 = arith.constant 0 : index
      %c0_18 = arith.constant 0 : index
      %c0_19 = arith.constant 0 : index
      %17 = vector.load %arg3[%c0_17, %c0_18, %c0_19] : memref<8x2x32xf32, #tpu.memory_space<vmem>>, vector<1x2x32xf32>
      %18 = vector.shape_cast %17 : vector<1x2x32xf32> to vector<2x32xf32>
      %19 = vector.shape_cast %16 : vector<2x32xf32> to vector<1x2x32xf32>
      tpu.vector_store %arg3[%c0_17, %c0_18, %c0_19], %19 {strides = array<i32>} : memref<8x2x32xf32, #tpu.memory_space<vmem>>, vector<1x2x32xf32>,
      %c0_20 = arith.constant 0 : index
      %c1 = arith.constant 1 : index
      %c0_21 = arith.constant 0 : index
      %20 = vector.load %arg4[%c0_20, %c1, %c0_21] : memref<2x8x32xf32, #tpu.memory_space<vmem>>, vector<2x1x32xf32>
      %21 = vector.shape_cast %20 : vector<2x1x32xf32> to vector<2x32xf32>
      %cst_22 = arith.constant 1.250000e-01 : f32
      %22 = vector.broadcast %cst_22 : f32 to vector<2x32xf32>
      %23 = arith.mulf %21, %22 : vector<2x32xf32>
      %cst_23 = arith.constant dense<0.000000e+00> : vector<2x32xf32>
      %24 = tpu.matmul %23, %11, %cst_23 {dimension_numbers = #tpu.dot_dimension_numbers<[1], [0], [0], [1], [0, 0, 1, 1], [], []>} : vector<2x32xf32>, vector<32x32xf32>, vector<2x32xf32> -> vector<2x32xf32>
      %c1_24 = arith.constant 1 : index
      %c0_25 = arith.constant 0 : index
      %c0_26 = arith.constant 0 : index
      %25 = vector.load %arg3[%c1_24, %c0_25, %c0_26] : memref<8x2x32xf32, #tpu.memory_space<vmem>>, vector<1x2x32xf32>
      %26 = vector.shape_cast %25 : vector<1x2x32xf32> to vector<2x32xf32>
      %27 = vector.shape_cast %24 : vector<2x32xf32> to vector<1x2x32xf32>
      tpu.vector_store %arg3[%c1_24, %c0_25, %c0_26], %27 {strides = array<i32>} : memref<8x2x32xf32, #tpu.memory_space<vmem>>, vector<1x2x32xf32>,
      %c0_27 = arith.constant 0 : index
      %c2 = arith.constant 2 : index
      %c0_28 = arith.constant 0 : index
      %28 = vector.load %arg4[%c0_27, %c2, %c0_28] : memref<2x8x32xf32, #tpu.memory_space<vmem>>, vector<2x1x32xf32>
      %29 = vector.shape_cast %28 : vector<2x1x32xf32> to vector<2x32xf32>
      %cst_29 = arith.constant 1.250000e-01 : f32
      %30 = vector.broadcast %cst_29 : f32 to vector<2x32xf32>
      %31 = arith.mulf %29, %30 : vector<2x32xf32>
      %cst_30 = arith.constant dense<0.000000e+00> : vector<2x32xf32>
      %32 = tpu.matmul %31, %11, %cst_30 {dimension_numbers = #tpu.dot_dimension_numbers<[1], [0], [0], [1], [0, 0, 1, 1], [], []>} : vector<2x32xf32>, vector<32x32xf32>, vector<2x32xf32> -> vector<2x32xf32>
      %c2_31 = arith.constant 2 : index
      %c0_32 = arith.constant 0 : index
      %c0_33 = arith.constant 0 : index
      %33 = vector.load %arg3[%c2_31, %c0_32, %c0_33] : memref<8x2x32xf32, #tpu.memory_space<vmem>>, vector<1x2x32xf32>
      %34 = vector.shape_cast %33 : vector<1x2x32xf32> to vector<2x32xf32>
      %35 = vector.shape_cast %32 : vector<2x32xf32> to vector<1x2x32xf32>
      tpu.vector_store %arg3[%c2_31, %c0_32, %c0_33], %35 {strides = array<i32>} : memref<8x2x32xf32, #tpu.memory_space<vmem>>, vector<1x2x32xf32>,
      %c0_34 = arith.constant 0 : index
      %c3 = arith.constant 3 : index
      %c0_35 = arith.constant 0 : index
      %36 = vector.load %arg4[%c0_34, %c3, %c0_35] : memref<2x8x32xf32, #tpu.memory_space<vmem>>, vector<2x1x32xf32>
      %37 = vector.shape_cast %36 : vector<2x1x32xf32> to vector<2x32xf32>
      %cst_36 = arith.constant 1.250000e-01 : f32
      %38 = vector.broadcast %cst_36 : f32 to vector<2x32xf32>
      %39 = arith.mulf %37, %38 : vector<2x32xf32>
      %cst_37 = arith.constant dense<0.000000e+00> : vector<2x32xf32>
      %40 = tpu.matmul %39, %11, %cst_37 {dimension_numbers = #tpu.dot_dimension_numbers<[1], [0], [0], [1], [0, 0, 1, 1], [], []>} : vector<2x32xf32>, vector<32x32xf32>, vector<2x32xf32> -> vector<2x32xf32>
      %c3_38 = arith.constant 3 : index
      %c0_39 = arith.constant 0 : index
      %c0_40 = arith.constant 0 : index
      %41 = vector.load %arg3[%c3_38, %c0_39, %c0_40] : memref<8x2x32xf32, #tpu.memory_space<vmem>>, vector<1x2x32xf32>
      %42 = vector.shape_cast %41 : vector<1x2x32xf32> to vector<2x32xf32>
      %43 = vector.shape_cast %40 : vector<2x32xf32> to vector<1x2x32xf32>
      tpu.vector_store %arg3[%c3_38, %c0_39, %c0_40], %43 {strides = array<i32>} : memref<8x2x32xf32, #tpu.memory_space<vmem>>, vector<1x2x32xf32>,
      %c0_41 = arith.constant 0 : index
      %c4 = arith.constant 4 : index
      %c0_42 = arith.constant 0 : index
      %44 = vector.load %arg4[%c0_41, %c4, %c0_42] : memref<2x8x32xf32, #tpu.memory_space<vmem>>, vector<2x1x32xf32>
      %45 = vector.shape_cast %44 : vector<2x1x32xf32> to vector<2x32xf32>
      %cst_43 = arith.constant 1.250000e-01 : f32
      %46 = vector.broadcast %cst_43 : f32 to vector<2x32xf32>
      %47 = arith.mulf %45, %46 : vector<2x32xf32>
      %cst_44 = arith.constant dense<0.000000e+00> : vector<2x32xf32>
      %48 = tpu.matmul %47, %11, %cst_44 {dimension_numbers = #tpu.dot_dimension_numbers<[1], [0], [0], [1], [0, 0, 1, 1], [], []>} : vector<2x32xf32>, vector<32x32xf32>, vector<2x32xf32> -> vector<2x32xf32>
      %c4_45 = arith.constant 4 : index
      %c0_46 = arith.constant 0 : index
      %c0_47 = arith.constant 0 : index
      %49 = vector.load %arg3[%c4_45, %c0_46, %c0_47] : memref<8x2x32xf32, #tpu.memory_space<vmem>>, vector<1x2x32xf32>
      %50 = vector.shape_cast %49 : vector<1x2x32xf32> to vector<2x32xf32>
      %51 = vector.shape_cast %48 : vector<2x32xf32> to vector<1x2x32xf32>
      tpu.vector_store %arg3[%c4_45, %c0_46, %c0_47], %51 {strides = array<i32>} : memref<8x2x32xf32, #tpu.memory_space<vmem>>, vector<1x2x32xf32>,
      %c0_48 = arith.constant 0 : index
      %c5 = arith.constant 5 : index
      %c0_49 = arith.constant 0 : index
      %52 = vector.load %arg4[%c0_48, %c5, %c0_49] : memref<2x8x32xf32, #tpu.memory_space<vmem>>, vector<2x1x32xf32>
      %53 = vector.shape_cast %52 : vector<2x1x32xf32> to vector<2x32xf32>
      %cst_50 = arith.constant 1.250000e-01 : f32
      %54 = vector.broadcast %cst_50 : f32 to vector<2x32xf32>
      %55 = arith.mulf %53, %54 : vector<2x32xf32>
      %cst_51 = arith.constant dense<0.000000e+00> : vector<2x32xf32>
      %56 = tpu.matmul %55, %11, %cst_51 {dimension_numbers = #tpu.dot_dimension_numbers<[1], [0], [0], [1], [0, 0, 1, 1], [], []>} : vector<2x32xf32>, vector<32x32xf32>, vector<2x32xf32> -> vector<2x32xf32>
      %c5_52 = arith.constant 5 : index
      %c0_53 = arith.constant 0 : index
      %c0_54 = arith.constant 0 : index
      %57 = vector.load %arg3[%c5_52, %c0_53, %c0_54] : memref<8x2x32xf32, #tpu.memory_space<vmem>>, vector<1x2x32xf32>
      %58 = vector.shape_cast %57 : vector<1x2x32xf32> to vector<2x32xf32>
      %59 = vector.shape_cast %56 : vector<2x32xf32> to vector<1x2x32xf32>
      tpu.vector_store %arg3[%c5_52, %c0_53, %c0_54], %59 {strides = array<i32>} : memref<8x2x32xf32, #tpu.memory_space<vmem>>, vector<1x2x32xf32>,
      %c0_55 = arith.constant 0 : index
      %c6 = arith.constant 6 : index
      %c0_56 = arith.constant 0 : index
      %60 = vector.load %arg4[%c0_55, %c6, %c0_56] : memref<2x8x32xf32, #tpu.memory_space<vmem>>, vector<2x1x32xf32>
      %61 = vector.shape_cast %60 : vector<2x1x32xf32> to vector<2x32xf32>
      %cst_57 = arith.constant 1.250000e-01 : f32
      %62 = vector.broadcast %cst_57 : f32 to vector<2x32xf32>
      %63 = arith.mulf %61, %62 : vector<2x32xf32>
      %cst_58 = arith.constant dense<0.000000e+00> : vector<2x32xf32>
      %64 = tpu.matmul %63, %11, %cst_58 {dimension_numbers = #tpu.dot_dimension_numbers<[1], [0], [0], [1], [0, 0, 1, 1], [], []>} : vector<2x32xf32>, vector<32x32xf32>, vector<2x32xf32> -> vector<2x32xf32>
      %c6_59 = arith.constant 6 : index
      %c0_60 = arith.constant 0 : index
      %c0_61 = arith.constant 0 : index
      %65 = vector.load %arg3[%c6_59, %c0_60, %c0_61] : memref<8x2x32xf32, #tpu.memory_space<vmem>>, vector<1x2x32xf32>
      %66 = vector.shape_cast %65 : vector<1x2x32xf32> to vector<2x32xf32>
      %67 = vector.shape_cast %64 : vector<2x32xf32> to vector<1x2x32xf32>
      tpu.vector_store %arg3[%c6_59, %c0_60, %c0_61], %67 {strides = array<i32>} : memref<8x2x32xf32, #tpu.memory_space<vmem>>, vector<1x2x32xf32>,
      %c0_62 = arith.constant 0 : index
      %c7 = arith.constant 7 : index
      %c0_63 = arith.constant 0 : index
      %68 = vector.load %arg4[%c0_62, %c7, %c0_63] : memref<2x8x32xf32, #tpu.memory_space<vmem>>, vector<2x1x32xf32>
      %69 = vector.shape_cast %68 : vector<2x1x32xf32> to vector<2x32xf32>
      %cst_64 = arith.constant 1.250000e-01 : f32
      %70 = vector.broadcast %cst_64 : f32 to vector<2x32xf32>
      %71 = arith.mulf %69, %70 : vector<2x32xf32>
      %cst_65 = arith.constant dense<0.000000e+00> : vector<2x32xf32>
      %72 = tpu.matmul %71, %11, %cst_65 {dimension_numbers = #tpu.dot_dimension_numbers<[1], [0], [0], [1], [0, 0, 1, 1], [], []>} : vector<2x32xf32>, vector<32x32xf32>, vector<2x32xf32> -> vector<2x32xf32>
      %c7_66 = arith.constant 7 : index
      %c0_67 = arith.constant 0 : index
      %c0_68 = arith.constant 0 : index
      %73 = vector.load %arg3[%c7_66, %c0_67, %c0_68] : memref<8x2x32xf32, #tpu.memory_space<vmem>>, vector<1x2x32xf32>
      %74 = vector.shape_cast %73 : vector<1x2x32xf32> to vector<2x32xf32>
      %75 = vector.shape_cast %72 : vector<2x32xf32> to vector<1x2x32xf32>
      tpu.vector_store %arg3[%c7_66, %c0_67, %c0_68], %75 {strides = array<i32>} : memref<8x2x32xf32, #tpu.memory_space<vmem>>, vector<1x2x32xf32>,
    } else {
    }
    return
  }
  func.func @transform_0(%arg0: i32) -> (i32, i32, i32, i32) {
    %c0_i32 = arith.constant 0 : i32
    %c0_i32_0 = arith.constant 0 : i32
    %c0_i32_1 = arith.constant 0 : i32
    %c0_i32_2 = arith.constant 0 : i32
    return %arg0, %c0_i32, %c0_i32_0, %c0_i32_1 : i32, i32, i32, i32
  }
  func.func @transform_1(%arg0: i32) -> (i32, i32) {
    %c0_i32 = arith.constant 0 : i32
    %c0_i32_0 = arith.constant 0 : i32
    %c0_i32_1 = arith.constant 0 : i32
    return %c0_i32, %c0_i32_0 : i32, i32
  }
  func.func @transform_2(%arg0: i32) -> (i32, i32, i32) {
    %c0_i32 = arith.constant 0 : i32
    %c0_i32_0 = arith.constant 0 : i32
    %c0_i32_1 = arith.constant 0 : i32
    %c0_i32_2 = arith.constant 0 : i32
    return %c0_i32, %c0_i32_0, %c0_i32_1 : i32, i32, i32
  }
}

</mosaic_0001>

<bundles_post_ra>
// kernel: tpu_custom_call.1
= control target key start
LH: loop header
LB: loop body
LE: loop exit
PB: predicated region body
PF: predicated region fallthrough
CT: control target
= control target key end

     0   :  { %7 = vsyncpa [#allocation4], 0  ;;  %s1536_s0 = inlined_call_operand.hbm [shape: f32[8,2,8,32], index: 0, kind: input, shape index: {}]   ;;  %s1537_s1 = inlined_call_operand.hbm [shape: f32[32,32], index: 1, kind: input, shape index: {}]   ;;  %s1538_s2 = inlined_call_operand.hbm [shape: f32[8,2,32], index: 2, kind: output, shape index: {}]  }
   0x1   :  { %9 = vsyncpa [#allocation4 + $0x1], 0 }
   0x2   :  { %10 = vsyncpa [#allocation7], 0 }
   0x3   :  { %11 = vsyncpa [#allocation5], 0  ;;  %s1279_s9 = smov 0   ;;  %s1281_s10 = smov 0  }
   0x4   :  { %s1283_s11 = smov 0   ;;  %s1285_s12 = smov 0  }
   0x5 LB: > { %s1298_s13 = sadd.s32 4294967295, %s1252_s12   ;;  %p37_p0 = scmp.ne.s32.totalorder %s1244_s10, %s1240_s9  ;;  %s1252_s12 = sphi %s1285_s12, %s1554_s12   ;;  %s1248_s11 = sphi %s1283_s11, %s1553_s11   ;;  %s1244_s10 = sphi %s1281_s10, %s1552_s10   ;;  %s1240_s9 = sphi %s1279_s9, %s1551_s9  }
   0x6   : > { %p1539_p1 = scmp.eq.s32.totalorder %s1298_s13, 0  ;;  %p916_p2 = scmp.ge.s32.totalorder %s1252_s12, 1 }
   0x7   : > { %p90_p3 = scmp.lt.s32.totalorder %s1252_s12, 9  ;;  %s1254_s16 = smov [#allocation6]  }
   0x8   : > { %p1307_p5 = por %p1539_p1, %p37_p0  ;;  %s102_s17 = sshll.u32 %s1254_s16, 4  ;;  %s103_s17 = int_to_ptr.vmem [resolvable:$true] %s102_s17 }
   0x9   : > { %p1311_p6 = pnand %p916_p2, %p90_p3  ;;  %s1324_s19 = sadd.s32 1, %s1252_s12  }
   0xa   : > { %s1542_s14 = scalar_select %p1307_p5, 1, 0 }
   0xb   : > { %s1543_s15 = scalar_select %p1311_p6, 1, 0 }
   0xc   : > { %p1078_p7 = pneg %p1311_p6  ;;  %s24_s20 = sadd.s32 1, %s1248_s11 }
   0xd   : > { %s21_s21 = ssub.s32 %s1252_s12, %s1324_s19  ;;  %s1143_s22 = scalar_lea.vmem %s103_s17, 512 }
   0xe   : > { %p1319_p8 = pnand %p1078_p7, %p1539_p1  ;;  %p1144_p10 = scmp.ne.s32.totalorder %s103_s17, %s1143_s22 }
   0xf   : > { %p1151_p13 = scmp.lt.s32.totalorder %s103_s17, %s103_s17  ;;  %p1152_p0 = scmp.lt.s32.totalorder %s1143_s22, %s1143_s22 }
  0x10   : > { %p1134_p9 = pneg %p1319_p8 }
  0x11   : > { %p1153_p2 = por %p1152_p0, %p1151_p13 }
  0x12   : > { %p1146_p11 = pnand %p1144_p10, %p1134_p9 }
  0x14   : > { %p1147_p12 = pneg %p1146_p11 }
  0x16   : > { %p1154_p3 = pnand %p1153_p2, %p1147_p12 }
  0x18   : > { %1157 = shalt.err (!%p1154_p3)
}
  0x19   : > { %s1255_s23 = smov 128   ;;  %s1256_s24 = smov 8  }
  0x1a   : > { %1081 = dma.hbm_to_vmem [thread:$0]  (!%p1319_p8), %s1537_s1, 512, %s103_s17, [#allocation7], %s1255_s23, %s1255_s23, %s1256_s24  }
  0x1b   : > { %p22_p7 = scmp.eq.s32.totalorder %s21_s21, 0  ;;  %p31_p9 = scmp.ne.s32.totalorder %s1248_s11, %s1244_s10 }
  0x1c   : > { %p32_p10 = scmp.eq.s32.totalorder %s1252_s12, 0  ;;  %p1087_p11 = scmp.lt.s32.totalorder %s1252_s12, 8 }
  0x1d   : > { %s1344_s27 = scalar_select %p22_p7, %s1248_s11, %s24_s20  }
  0x1e   : > { %p33_p12 = por %p32_p10, %p31_p9  ;;  %s116_s28 = sand.u32 1, %s1248_s11  }
  0x1f   : > { %s919_s29 = sshll.u32 %s116_s28, 4  ;;  %s939_s30 = sshll.u32 %s1252_s12, 8 }
  0x20   : > { %s1351_s5 = scalar_lea.hbm %s1536_s0, %s939_s30  ;;  %s120_s6 = scalar_lea.vmem [#allocation3], %s919_s29 }
  0x21   : > { %s127_s7 = sshll.u32 %s120_s6, 4  ;;  %p1355_p8 = pnand %p1087_p11, %p33_p12  ;;  %s1353_s7 = int_to_ptr.vmem [resolvable:$true] %s127_s7 }
  0x22   : > { %s1359_s9 = scalar_lea.sflag [#allocation4], %s116_s28  ;;  %s1158_s12 = scalar_lea.hbm %s1351_s5, 256 }
  0x23   : > { %p1159_p13 = scmp.ne.s32.totalorder %s1351_s5, %s1158_s12  ;;  %p1160_p0 = pneg %p1355_p8 }
  0x24   : > { %s1163_s18 = scalar_lea.hbm %s1536_s0, 2048  ;;  %p1164_p7 = scmp.lt.s32.totalorder %s1351_s5, %s1536_s0 }
  0x25   : > { %p1161_p2 = pnand %p1160_p0, %p1159_p13  ;;  %p1165_p9 = scmp.lt.s32.totalorder %s1163_s18, %s1158_s12 }
  0x27   : > { %p1162_p3 = pneg %p1161_p2  ;;  %p1166_p10 = por %p1165_p9, %p1164_p7 }
  0x29   : > { %p1167_p11 = pnand %p1166_p10, %p1162_p3 }
  0x2b   : > { %1170 = shalt.err (!%p1167_p11)
}
  0x2c   : > { %s1171_s22 = scalar_lea.vmem %s1353_s7, 256  ;;  %s1257_s25 = smov [#allocation3]  }
  0x2d   : > { %p1172_p12 = scmp.ne.s32.totalorder %s1353_s7, %s1171_s22  ;;  %s1176_s26 = sshll.u32 %s1257_s25, 4  ;;  %s1177_s26 = int_to_ptr.vmem [resolvable:$false] %s1176_s26 }
  0x2e   : > { %s1178_s28 = scalar_lea.vmem %s1177_s26, 512  ;;  %p1179_p2 = scmp.lt.s32.totalorder %s1353_s7, %s1177_s26 }
  0x2f   : > { %p1174_p4 = pnand %p1172_p12, %p1160_p0  ;;  %p1180_p1 = scmp.lt.s32.totalorder %s1178_s28, %s1171_s22 }
  0x31   : > { %p1175_p13 = pneg %p1174_p4  ;;  %p1181_p5 = por %p1180_p1, %p1179_p2 }
  0x33   : > { %p1182_p6 = pnand %p1181_p5, %p1175_p13 }
  0x35   : > { %1185 = shalt.err (!%p1182_p6)
}
  0x36   : > { %1085 = dma.hbm_to_vmem [thread:$0]  (!%p1355_p8), %s1351_s5, 256, %s1353_s7, %s1359_s9, %s1255_s23, %s1255_s23, %s1256_s24  }
  0x37   : > { %p1546_p4 = scmp.ne.s32.totalorder %s1543_s15, 0 }
  0x38   : > { %s141_s29 = sand.u32 (!%p1546_p4), 1, %s1244_s10   ;;  %p1547_p1 = scmp.ne.s32.totalorder (!%p1546_p4), %s1542_s14, 0 }
  0x39   : > { %139 = sbr.rel (%p1546_p4) target bundleno = 338 (0x152), region = 28  ;;  %s923_s30 = sshll.u32 (!%p1546_p4), %s141_s29, 4 }
  0x3a   : > { %s142_s3 = scalar_lea.sflag (!%p1546_p4), [#allocation4], %s141_s29  ;;  %s145_s4 = scalar_lea.vmem (!%p1546_p4), [#allocation3], %s923_s30 }
  0x3e   : > { %1227 = dma.done.wait (%p1547_p1), %s142_s3, 256  }
  0x3f   : > { %1229 = vsyncadd (%p1547_p1), %s142_s3, 4294967040  ;;  %p1548_p5 = scmp.eq.s32.totalorder %s1298_s13, 0 }
  0x41   : > { %1231 = dma.done.wait (%p1548_p5), [#allocation7], 512   ;;  %p1549_p6 = pmov %p1548_p5 }
  0x42   : > { %p1550_p8 = scmp.ne.s32.totalorder %s1298_s13, 0 }
  0x43   : > { %1233 = vsyncadd (%p1549_p6), [#allocation7], 4294966784 }
  0x44   : > { %168 = sbr.rel (%p1550_p8) target bundleno = 75 (0x4b), region = 40 }
  0x49   : > { %vm169_vm0 = vcmask 261120   ;;  %v1258_v0 = vmov 0.0  }
  0x4a   : > { %170 = vst.msk [vmem:[#allocation2] sm:$0xff] %vm169_vm0, %v1258_v0  ;;  %171 = vst.msk [vmem:[#allocation2 + $0x8] sm:$0xff] %vm169_vm0, %v1258_v0 }
  0x4b PF: > { %v174_v2 = vld [vmem:[%s145_s4] sm:$0xff]  ;;  %vm178_vm1 = vcmask 261120   ;;  %v175_v5 = vld [vmem:[%s145_s4 + $0x8] sm:$0xff]  ;;  %p926_p0 = scmp.ne.s32.totalorder %s1298_s13, 7 }
  0x50   : > { %184 = sbr.rel (%p926_p0) target bundleno = 322 (0x142), region = 44 }
  0x51   : > { %v172_v1 = vld [vmem:[#allocation2] sm:$0xff]  ;;  %v173_v3 = vld [vmem:[#allocation2 + $0x8] sm:$0xff] }
  0x52   : > { %v176_v4 = vadd.f32 %v174_v2, %v172_v1  ;;  %v177_v6 = vadd.f32 %v175_v5, %v173_v3 }
  0x54   : > { %179 = vst.msk [vmem:[#allocation2] sm:$0xff] %vm178_vm1, %v176_v4  ;;  %180 = vst.msk [vmem:[#allocation2 + $0x8] sm:$0xff] %vm178_vm1, %v177_v6 }
  0x55   : > { %v1399_v7 = vld [vmem:[#allocation6 + $0x18] sm:$0xff]  ;;  %v1259_v8 = vmov 0.0   ;;  %v1403_v9 = vld [vmem:[#allocation6 + $0x10] sm:$0xff]  ;;  %v1409_v15 = vld [vmem:[#allocation6 + $0x8] sm:$0xff]  ;;  %vm196_vm2 = vcmask 1041409   ;;  %vm1260_vm3 = vmmov 0  }
  0x56   : > { %980 = vmatprep.subr.mxu0 %v1259_v8  ;;  %991 = vmatprep.subr.mxu1 %v1259_v8  ;;  %v1415_v20 = vld [vmem:[#allocation6] sm:$0xff]  ;;  %vm270_vm4 = vcmask 254976  }
  0x57   : > { %981 = vmatpush3.msra.mxu0 %v1399_v7  ;;  %992 = vmatpush3.msra.mxu1 %v1399_v7 }
  0x58   : > { %982 = vmatprep.subr.mxu0 %v1259_v8  ;;  %993 = vmatprep.subr.mxu1 %v1259_v8 }
  0x59   : > { %983 = vmatpush3.msra.mxu0 %v1403_v9  ;;  %994 = vmatpush3.msra.mxu1 %v1403_v9 }
  0x5a   : > { %984 = vmatprep.subr.mxu0 %v1259_v8  ;;  %995 = vmatprep.subr.mxu1 %v1259_v8 }
  0x5b   : > { %v189_v10 = vld [vmem:[#allocation2] sm:$0x1]  ;;  %v190_v11 = vld [vmem:[#allocation2 + $0x8] sm:$0x1]  ;;  %v272_v13 = vld [vmem:[#allocation2 + $0x1] sm:$0x1]  ;;  %985 = vmatpush3.msra.mxu0 %v1409_v15  ;;  %996 = vmatpush3.msra.mxu1 %v1409_v15 }
  0x5c   : > { %v192_v12 = vmul.f32 0.125, %v190_v11  ;;  %v273_v14 = vld [vmem:[#allocation2 + $0x9] sm:$0x1]  ;;  %v191_v16 = vmul.f32 0.125, %v189_v10  ;;  %v274_v17 = vmul.f32 0.125, %v272_v13  ;;  %986 = vmatprep.subr.mxu0 %v1259_v8  ;;  %997 = vmatprep.subr.mxu1 %v1259_v8 }
  0x5d   : > { %v275_v18 = vmul.f32 0.125, %v273_v14  ;;  %v355_v22 = vld [vmem:[#allocation2 + $0xa] sm:$0x1]  ;;  %v437_v23 = vld [vmem:[#allocation2 + $0xb] sm:$0x1]  ;;  %987 = vmatpush3.msra.mxu0 %v1415_v20  ;;  %988 = vmatprep.mubr.msk.f32.mxu0 %vm1260_vm3, %v1259_v8 }
  0x5e   : > { %v195_v19 = vrot.slane %v192_v12, 7  ;;  %998 = vmatpush3.msra.mxu1 %v1415_v20  ;;  %999 = vmatprep.mubr.msk.f32.mxu1 %vm1260_vm3, %v1259_v8  ;;  %v357_v26 = vmul.f32 0.125, %v355_v22  ;;  %v439_v27 = vmul.f32 0.125, %v437_v23  ;;  %v354_v28 = vld [vmem:[#allocation2 + $0x2] sm:$0x1] }
  0x5f   : > { %v278_v21 = vrot.slane %v275_v18, 7  ;;  %v436_v29 = vld [vmem:[#allocation2 + $0x3] sm:$0x1]  ;;  %1002 = vmatprep.subr.mxu0 %v1259_v8  ;;  %1013 = vmatprep.subr.mxu1 %v1259_v8  ;;  %v356_v30 = vmul.f32 0.125, %v354_v28  ;;  %v519_v34 = vld [vmem:[#allocation2 + $0xc] sm:$0x1] }
  0x60   : > { %v197_v24 = vsel %vm196_vm2, %v195_v19, %v191_v16  ;;  %v360_v31 = vrot.slane %v357_v26, 7  ;;  %v438_v32 = vmul.f32 0.125, %v436_v29  ;;  %v442_v33 = vrot.slane %v439_v27, 7  ;;  %v601_v35 = vld [vmem:[#allocation2 + $0xd] sm:$0x1] }
  0x61   : > { %v279_v25 = vsel %vm196_vm2, %v278_v21, %v274_v17  ;;  %989 = vmatmul.mubr.msk.f32.vlgmr.msra.gmra.mxu0 %vm178_vm1, %v197_v24  ;;  %v521_v38 = vmul.f32 0.125, %v519_v34  ;;  %v603_v39 = vmul.f32 0.125, %v601_v35  ;;  %v518_v40 = vld [vmem:[#allocation2 + $0x4] sm:$0x1]  ;;  %v600_v41 = vld [vmem:[#allocation2 + $0x5] sm:$0x1] }
  0x62   : > { %1000 = vmatmul.mubr.msk.f32.vlgmr.msra.gmra.mxu1 %vm178_vm1, %v279_v25  ;;  %1003 = vmatpush3.msra.mxu0 %v1399_v7  ;;  %v361_v36 = vsel %vm196_vm2, %v360_v31, %v356_v30  ;;  %v443_v37 = vsel %vm196_vm2, %v442_v33, %v438_v32  ;;  %v520_v42 = vmul.f32 0.125, %v518_v40  ;;  %v602_v44 = vmul.f32 0.125, %v600_v41  ;;  %v683_v46 = vld [vmem:[#allocation2 + $0xe] sm:$0x1]  ;;  %v765_v47 = vld [vmem:[#allocation2 + $0xf] sm:$0x1] }
  0x63   : > { %1014 = vmatpush3.msra.mxu1 %v1399_v7  ;;  %1004 = vmatprep.subr.mxu0 %v1259_v8  ;;  %v524_v43 = vrot.slane %v521_v38, 7  ;;  %v606_v45 = vrot.slane %v603_v39, 7  ;;  %v685_v50 = vmul.f32 0.125, %v683_v46  ;;  %v767_v51 = vmul.f32 0.125, %v765_v47  ;;  %v682_v52 = vld [vmem:[#allocation2 + $0x6] sm:$0x1] }
  0x64   : > { %1015 = vmatprep.subr.mxu1 %v1259_v8  ;;  %1005 = vmatpush3.msra.mxu0 %v1403_v9  ;;  %v764_v53 = vld [vmem:[#allocation2 + $0x7] sm:$0x1]  ;;  %v684_v54 = vmul.f32 0.125, %v682_v52 }
  0x65   : > { %1016 = vmatpush3.msra.mxu1 %v1403_v9  ;;  %1006 = vmatprep.subr.mxu0 %v1259_v8  ;;  %v525_v48 = vsel %vm196_vm2, %v524_v43, %v520_v42  ;;  %v607_v49 = vsel %vm196_vm2, %v606_v45, %v602_v44  ;;  %v688_v55 = vrot.slane %v685_v50, 7  ;;  %v766_v56 = vmul.f32 0.125, %v764_v53 }
  0x66   : > { %1017 = vmatprep.subr.mxu1 %v1259_v8  ;;  %1007 = vmatpush3.msra.mxu0 %v1409_v15  ;;  %v770_v57 = vrot.slane %v767_v51, 7 }
  0x67   : > { %1018 = vmatpush3.msra.mxu1 %v1409_v15  ;;  %1008 = vmatprep.subr.mxu0 %v1259_v8  ;;  %v689_v58 = vsel %vm196_vm2, %v688_v55, %v684_v54 }
  0x68   : > { %1019 = vmatprep.subr.mxu1 %v1259_v8  ;;  %1009 = vmatpush3.msra.mxu0 %v1415_v20  ;;  %v771_v59 = vsel %vm196_vm2, %v770_v57, %v766_v56 }
  0x69   : > { %1010 = vmatprep.mubr.msk.f32.mxu0 %vm1260_vm3, %v1259_v8  ;;  %1020 = vmatpush3.msra.mxu1 %v1415_v20 }
  0x6a   : > { %1021 = vmatprep.mubr.msk.f32.mxu1 %vm1260_vm3, %v1259_v8  ;;  %1011 = vmatmul.mubr.msk.f32.vlgmr.msra.gmra.mxu0 %vm178_vm1, %v361_v36 }
  0x6b   : > { %1022 = vmatmul.mubr.msk.f32.vlgmr.msra.gmra.mxu1 %vm178_vm1, %v443_v37  ;;  %1024 = vmatprep.subr.mxu0 %v1259_v8 }
  0x6c   : > { %1035 = vmatprep.subr.mxu1 %v1259_v8  ;;  %1025 = vmatpush3.msra.mxu0 %v1399_v7 }
  0x6d   : > { %1036 = vmatpush3.msra.mxu1 %v1399_v7  ;;  %1026 = vmatprep.subr.mxu0 %v1259_v8 }
  0x6e   : > { %1037 = vmatprep.subr.mxu1 %v1259_v8  ;;  %1027 = vmatpush3.msra.mxu0 %v1403_v9 }
  0x6f   : > { %1038 = vmatpush3.msra.mxu1 %v1403_v9  ;;  %1028 = vmatprep.subr.mxu0 %v1259_v8 }
  0x70   : > { %1039 = vmatprep.subr.mxu1 %v1259_v8  ;;  %1029 = vmatpush3.msra.mxu0 %v1409_v15 }
  0x71   : > { %1040 = vmatpush3.msra.mxu1 %v1409_v15  ;;  %1030 = vmatprep.subr.mxu0 %v1259_v8 }
  0x72   : > { %1041 = vmatprep.subr.mxu1 %v1259_v8  ;;  %1031 = vmatpush3.msra.mxu0 %v1415_v20 }
  0x73   : > { %1032 = vmatprep.mubr.msk.f32.mxu0 %vm1260_vm3, %v1259_v8  ;;  %1042 = vmatpush3.msra.mxu1 %v1415_v20 }
  0x74   : > { %1043 = vmatprep.mubr.msk.f32.mxu1 %vm1260_vm3, %v1259_v8  ;;  %1033 = vmatmul.mubr.msk.f32.vlgmr.msra.gmra.mxu0 %vm178_vm1, %v525_v48 }
  0x75   : > { %1044 = vmatmul.mubr.msk.f32.vlgmr.msra.gmra.mxu1 %vm178_vm1, %v607_v49  ;;  %1046 = vmatprep.subr.mxu0 %v1259_v8 }
  0x76   : > { %1057 = vmatprep.subr.mxu1 %v1259_v8  ;;  %1047 = vmatpush3.msra.mxu0 %v1399_v7 }
  0x77   : > { %1058 = vmatpush3.msra.mxu1 %v1399_v7  ;;  %1048 = vmatprep.subr.mxu0 %v1259_v8 }
  0x78   : > { %1059 = vmatprep.subr.mxu1 %v1259_v8  ;;  %1049 = vmatpush3.msra.mxu0 %v1403_v9 }
  0x79   : > { %1060 = vmatpush3.msra.mxu1 %v1403_v9  ;;  %1050 = vmatprep.subr.mxu0 %v1259_v8 }
  0x7a   : > { %1061 = vmatprep.subr.mxu1 %v1259_v8  ;;  %1051 = vmatpush3.msra.mxu0 %v1409_v15 }
  0x7b   : > { %1062 = vmatpush3.msra.mxu1 %v1409_v15  ;;  %1052 = vmatprep.subr.mxu0 %v1259_v8 }
  0x7c   : > { %1063 = vmatprep.subr.mxu1 %v1259_v8  ;;  %1053 = vmatpush3.msra.mxu0 %v1415_v20 }
  0x7d   : > { %1054 = vmatprep.mubr.msk.f32.mxu0 %vm1260_vm3, %v1259_v8  ;;  %1064 = vmatpush3.msra.mxu1 %v1415_v20 }
  0x7e   : > { %1065 = vmatprep.mubr.msk.f32.mxu1 %vm1260_vm3, %v1259_v8  ;;  %1055 = vmatmul.mubr.msk.f32.vlgmr.msra.gmra.mxu0 %vm178_vm1, %v689_v58 }
  0x7f   : > { %1066 = vmatmul.mubr.msk.f32.vlgmr.msra.gmra.mxu1 %vm178_vm1, %v771_v59 }
 0x121   : > { %v266_v60 = vpop.f32.mrf.mxu0 }
 0x122   : > { %v348_v61 = vpop.f32.mrf.mxu1  ;;  %271 = vst.msk [vmem:[#allocation8] sm:$0x3] %vm270_vm4, %v266_v60 }
 0x123   : > { %353 = vst.msk [vmem:[#allocation8 + $0x2] sm:$0x3] %vm270_vm4, %v348_v61  ;;  %v990_v62 = vpop.f32.mrf.mxu0 }
 0x124   : > { %v1001_v63 = vpop.f32.mrf.mxu1 }
 0x12a   : > { %v430_v0 = vpop.f32.mrf.mxu0 }
 0x12b   : > { %v512_v1 = vpop.f32.mrf.mxu1  ;;  %435 = vst.msk [vmem:[#allocation8 + $0x4] sm:$0x3] %vm270_vm4, %v430_v0 }
 0x12c   : > { %517 = vst.msk [vmem:[#allocation8 + $0x6] sm:$0x3] %vm270_vm4, %v512_v1  ;;  %v1012_v2 = vpop.f32.mrf.mxu0 }
 0x12d   : > { %v1023_v3 = vpop.f32.mrf.mxu1 }
 0x134   : > { %v594_v4 = vpop.f32.mrf.mxu0 }
 0x135   : > { %v676_v5 = vpop.f32.mrf.mxu1  ;;  %599 = vst.msk [vmem:[#allocation8 + $0x8] sm:$0x3] %vm270_vm4, %v594_v4 }
 0x136   : > { %681 = vst.msk [vmem:[#allocation8 + $0xa] sm:$0x3] %vm270_vm4, %v676_v5  ;;  %v1034_v6 = vpop.f32.mrf.mxu0 }
 0x137   : > { %v1045_v7 = vpop.f32.mrf.mxu1 }
 0x13e   : > { %v758_v8 = vpop.f32.mrf.mxu0 }
 0x13f   : > { %v840_v9 = vpop.f32.mrf.mxu1  ;;  %763 = vst.msk [vmem:[#allocation8 + $0xc] sm:$0x3] %vm270_vm4, %v758_v8 }
 0x140   : > { %845 = vst.msk [vmem:[#allocation8 + $0xe] sm:$0x3] %vm270_vm4, %v840_v9  ;;  %v1056_v10 = vpop.f32.mrf.mxu0 }
 0x141   : > { %v1067_v11 = vpop.f32.mrf.mxu1 }
 0x142 PF: > { %p1089_p3 = scmp.eq.s32.totalorder %s1298_s13, 7  ;;  %s1261_s14 = smov [#allocation8]  }
 0x143   : > { %s852_s15 = sshll.u32 %s1261_s14, 4  ;;  %s853_s15 = int_to_ptr.vmem [resolvable:$true] %s852_s15 }
 0x144   : > { %s1186_s23 = scalar_lea.vmem %s853_s15, 256  ;;  %p1193_p11 = scmp.lt.s32.totalorder %s853_s15, %s853_s15 }
 0x145   : > { %p1187_p7 = scmp.ne.s32.totalorder %s853_s15, %s1186_s23  ;;  %p1194_p12 = scmp.lt.s32.totalorder %s1186_s23, %s1186_s23 }
 0x147   : > { %p1188_p9 = pnand %p1187_p7, %p1089_p3  ;;  %p1195_p13 = por %p1194_p12, %p1193_p11 }
 0x149   : > { %p1189_p10 = pneg %p1188_p9 }
 0x14b   : > { %p1196_p2 = pnand %p1195_p13, %p1189_p10 }
 0x14d   : > { %1199 = shalt.err (!%p1196_p2)
}
 0x14e   : > { %s1262_s24 = smov 32   ;;  %s1263_s5 = smov 2  }
 0x14f   : > { %1075 = dma.vmem_to_hbm [thread:$0]  (%p1089_p3), %s853_s15, 256, %s1538_s2, [#allocation5], %s1262_s24, %s1262_s24, %s1263_s5  }
 0x150   : > { %1235 = dma.done.wait (%p1089_p3), [#allocation5], 256  }
 0x151   : > { %1237 = vsyncadd (%p1089_p3), [#allocation5], 4294967040 }
 0x152 PF: > { %p14_p4 = scmp.ge.s32.totalorder %s1324_s19, 10   ;;  %s1551_s9 = smov %s1244_s10 }
 0x153   : > { %s1552_s10 = smov %s1248_s11  ;;  %s1553_s11 = smov %s1344_s27 }
 0x154   : > { %s1554_s12 = smov %s1324_s19  ;;  %16 = sbr.rel (!%p14_p4) target bundleno = 5 (0x5), region = 84 }
 0x159   :  { %868 = vsyncpa [#allocation4], 1 }
 0x15a   :  { %870 = vsyncpa [#allocation4 + $0x1], 1 }
 0x15b   :  { %871 = vsyncpa [#allocation7], 1 }
 0x15c   :  { %872 = vsyncpa [#allocation5], 1 }
 0x15d   :  { %874 = vsyncpa [#allocation5 + $0x1], 1 }

</bundles_post_ra>
